<compile_context>
chip_gen: v7x
topology: tpu7x:2x2x1
jax: 0.10.0
libtpu: 0.0.40
codegen_flags: <defaults>
</compile_context>

<pallas_src>
import jax
import jax.numpy as jnp
from jax.experimental import pallas as pl
from jax.experimental.pallas import tpu as pltpu


# ---------------------------------------------------------------------------
# Kernel 1: h = dropout(relu((A @ X) @ W1))
# ---------------------------------------------------------------------------
def conv1_kernel(a_ref, x_ref, w1_ref, mask_ref, h_ref, acc_ref):
    k = pl.program_id(1)

    @pl.when(k == 0)
    def _():
        acc_ref[...] = jnp.zeros_like(acc_ref)

    # acc += A[i, k] @ X[k]   (bf16 operands, f32 accumulation)
    acc_ref[...] += jnp.dot(a_ref[...], x_ref[...],
                            preferred_element_type=jnp.float32)

    @pl.when(k == pl.num_programs(1) - 1)
    def _():
        ax = acc_ref[...].astype(jnp.bfloat16)
        h = jnp.dot(ax, w1_ref[...], preferred_element_type=jnp.float32)
        h = jnp.maximum(h, 0.0)
        # Dropout(p=0.5): mask is pre-scaled (0.0 or 1/(1-p)) -> one VPU mul.
        h = h * mask_ref[...]
        # TODO(synk): the PyTorch forward prints the post-dropout tensor; no
        # clean Pallas equivalent for host-side printing of a full tensor.
        h_ref[...] = h.astype(h_ref.dtype)


# ---------------------------------------------------------------------------
# Kernel 2: out = log_softmax(A @ (h @ W2), axis=1)
# ---------------------------------------------------------------------------
def conv2_kernel(a_ref, h_ref, w2_ref, out_ref, acc_ref):
    k = pl.program_id(1)

    @pl.when(k == 0)
    def _():
        acc_ref[...] = jnp.zeros_like(acc_ref)

    # s = h[k] @ W2  (small F_out), then acc += A[i, k] @ s
    s = jnp.dot(h_ref[...], w2_ref[...], preferred_element_type=jnp.float32)
    acc_ref[...] += jnp.dot(a_ref[...], s.astype(jnp.bfloat16),
                            preferred_element_type=jnp.float32)

    @pl.when(k == pl.num_programs(1) - 1)
    def _():
        z = acc_ref[...]
        m = jnp.max(z, axis=1, keepdims=True)
        shifted = z - m
        lse = jnp.log(jnp.sum(jnp.exp(shifted), axis=1, keepdims=True))
        out_ref[...] = (shifted - lse).astype(out_ref.dtype)


# ---------------------------------------------------------------------------
# Wrapper
# ---------------------------------------------------------------------------
def _tile(n, pref=256):
    if n <= pref:
        return n
    assert n % pref == 0, "node count must divide the row tile"
    return pref


def gcn_forward(X, A, W1, W2, *, dropout_key, training=True, p=0.5):
    N, f_in = X.shape
    hidden = W1.shape[1]
    f_out = W2.shape[1]

    # bf16 MXU operands; accumulation stays f32 inside the kernels.
    Ab = A.astype(jnp.bfloat16)
    Xb = X.astype(jnp.bfloat16)
    W1b = W1.astype(jnp.bfloat16)
    W2b = W2.astype(jnp.bfloat16)

    # Training-mode dropout mask (pre-scaled by 1/(1-p)); eval -> identity.
    if training:
        keep = jax.random.bernoulli(dropout_key, p=1.0 - p, shape=(N, hidden))
        mask = keep.astype(jnp.float32) * (1.0 / (1.0 - p))
    else:
        mask = jnp.ones((N, hidden), jnp.float32)

    tm = _tile(N)
    tk = _tile(N)
    grid = (N // tm, N // tk)
    dims = ("parallel", "arbitrary")

    cost1 = pl.CostEstimate(
        flops=2 * N * N * f_in + 2 * N * f_in * hidden,
        transcendentals=0,
        bytes_accessed=2 * (N * N + N * f_in + f_in * hidden + N * hidden)
        + 4 * N * hidden,
    )
    h = pl.pallas_call(
        conv1_kernel,
        out_shape=jax.ShapeDtypeStruct((N, hidden), jnp.bfloat16),
        grid_spec=pltpu.PrefetchScalarGridSpec(
            num_scalar_prefetch=0,
            grid=grid,
            in_specs=[
                pl.BlockSpec((tm, tk), lambda i, k: (i, k)),        # A
                pl.BlockSpec((tk, f_in), lambda i, k: (k, 0)),      # X
                pl.BlockSpec((f_in, hidden), lambda i, k: (0, 0)),  # W1
                pl.BlockSpec((tm, hidden), lambda i, k: (i, 0)),    # mask
            ],
            out_specs=pl.BlockSpec((tm, hidden), lambda i, k: (i, 0)),
            scratch_shapes=[pltpu.VMEM((tm, f_in), jnp.float32)],
        ),
        compiler_params=pltpu.CompilerParams(dimension_semantics=dims),
        cost_estimate=cost1,
    )(Ab, Xb, W1b, mask)

    cost2 = pl.CostEstimate(
        flops=2 * N * N * f_out + 2 * (N // tm) * N * hidden * f_out,
        transcendentals=N * f_out,
        bytes_accessed=2 * (N * N + N * hidden + hidden * f_out) + 4 * N * f_out,
    )
    out = pl.pallas_call(
        conv2_kernel,
        out_shape=jax.ShapeDtypeStruct((N, f_out), jnp.float32),
        grid_spec=pltpu.PrefetchScalarGridSpec(
            num_scalar_prefetch=0,
            grid=grid,
            in_specs=[
                pl.BlockSpec((tm, tk), lambda i, k: (i, k)),         # A
                pl.BlockSpec((tk, hidden), lambda i, k: (k, 0)),     # h
                pl.BlockSpec((hidden, f_out), lambda i, k: (0, 0)),  # W2
            ],
            out_specs=pl.BlockSpec((tm, f_out), lambda i, k: (i, 0)),
            scratch_shapes=[pltpu.VMEM((tm, f_out), jnp.float32)],
        ),
        compiler_params=pltpu.CompilerParams(dimension_semantics=dims),
        cost_estimate=cost2,
    )(Ab, h, W2b)
    return out


def xavier_uniform(key, shape, dtype=jnp.float32):
    fan_in, fan_out = shape
    limit = (6.0 / (fan_in + fan_out)) ** 0.5
    return jax.random.uniform(key, shape, dtype=dtype, minval=-limit, maxval=limit)


if __name__ == "__main__":
    # Small shapes consistent with the module: N nodes, in -> hidden -> out.
    N, in_features, hidden_size, out_features = 8, 16, 32, 8

    key = jax.random.PRNGKey(0)
    k_x, k_a, k_w1, k_w2, k_drop = jax.random.split(key, 5)

    # Dense node features (torch.sparse.Tensor is used densely via sparse.mm).
    X = jax.random.normal(k_x, (N, in_features), dtype=jnp.float32)

    # Symmetrically normalized adjacency with self-loops (typical GCN input).
    adj_raw = (jax.random.uniform(k_a, (N, N)) > 0.7).astype(jnp.float32)
    adj = jnp.maximum(adj_raw, adj_raw.T) + jnp.eye(N, dtype=jnp.float32)
    deg = jnp.sum(adj, axis=1)
    d_inv_sqrt = 1.0 / jnp.sqrt(deg)
    A = adj * d_inv_sqrt[:, None] * d_inv_sqrt[None, :]

    # Deterministic xavier-uniform weights (same shapes as GraphConvolutionLayer.W).
    W1 = xavier_uniform(k_w1, (in_features, hidden_size))
    W2 = xavier_uniform(k_w2, (hidden_size, out_features))

    out = gcn_forward(X, A, W1, W2, dropout_key=k_drop, training=True)
    jax.block_until_ready(out)

    assert out.shape == (N, out_features)
    # log-softmax rows must exp-sum to ~1
    row_sums = jnp.sum(jnp.exp(out), axis=1)
    assert jnp.allclose(row_sums, 1.0, atol=1e-4)
    print("KERNEL_OK")
</pallas_src>

<mosaic_0001>
module attributes {stable_mosaic.version = 11 : i64} {
  func.func @conv1_kernel(%arg0: i32, %arg1: i32, %arg2: memref<8x8xbf16, #tpu.memory_space<vmem>>, %arg3: memref<8x16xbf16, #tpu.memory_space<vmem>>, %arg4: memref<16x32xbf16, #tpu.memory_space<vmem>>, %arg5: memref<8x32xf32, #tpu.memory_space<vmem>>, %arg6: memref<8x32xbf16, #tpu.memory_space<vmem>>, %arg7: memref<8x16xf32, #tpu.memory_space<vmem>>) attributes {dimension_semantics = [#tpu.dimension_semantics<parallel>, #tpu.dimension_semantics<arbitrary>], iteration_bounds = array<i64: 1, 1>, scalar_prefetch = 0 : i64, scratch_operands = 1 : i64, tpu.core_type = #tpu.core_type<tc>, window_params = [{transform_indices = @transform_0, window_bounds = array<i64: 8, 8>}, {transform_indices = @transform_1, window_bounds = array<i64: 8, 16>}, {pipeline_mode = #tpu.pipeline_mode<synchronous>, transform_indices = @transform_2, window_bounds = array<i64: 16, 32>}, {transform_indices = @transform_3, window_bounds = array<i64: 8, 32>}, {transform_indices = @transform_4, window_bounds = array<i64: 8, 32>}]} {
    %c0_i32 = arith.constant 0 : i32
    %0 = arith.cmpi eq, %arg1, %c0_i32 : i32
    %1 = arith.extui %0 : i1 to i32
    %c0_i32_0 = arith.constant 0 : i32
    %2 = arith.cmpi ne, %1, %c0_i32_0 : i32
    scf.if %2 {
      %cst_10 = arith.constant 0.000000e+00 : f32
      %12 = vector.broadcast %cst_10 : f32 to vector<8x16xf32>
      %c0_11 = arith.constant 0 : index
      %c0_12 = arith.constant 0 : index
      %13 = vector.load %arg7[%c0_11, %c0_12] : memref<8x16xf32, #tpu.memory_space<vmem>>, vector<8x16xf32>
      tpu.vector_store %arg7[%c0_11, %c0_12], %12 {strides = array<i32>} : memref<8x16xf32, #tpu.memory_space<vmem>>, vector<8x16xf32>,
    } else {
    }
    %c0 = arith.constant 0 : index
    %c0_1 = arith.constant 0 : index
    %3 = vector.load %arg7[%c0, %c0_1] : memref<8x16xf32, #tpu.memory_space<vmem>>, vector<8x16xf32>
    %c0_2 = arith.constant 0 : index
    %c0_3 = arith.constant 0 : index
    %4 = vector.load %arg2[%c0_2, %c0_3] : memref<8x8xbf16, #tpu.memory_space<vmem>>, vector<8x8xbf16>
    %c0_4 = arith.constant 0 : index
    %c0_5 = arith.constant 0 : index
    %5 = vector.load %arg3[%c0_4, %c0_5] : memref<8x16xbf16, #tpu.memory_space<vmem>>, vector<8x16xbf16>
    %cst = arith.constant dense<0.000000e+00> : vector<8x16xf32>
    %6 = tpu.matmul %4, %5, %cst {dimension_numbers = #tpu.dot_dimension_numbers<[1], [0], [0], [1], [0, 0, 1, 1], [], []>} : vector<8x8xbf16>, vector<8x16xbf16>, vector<8x16xf32> -> vector<8x16xf32>
    %7 = arith.addf %3, %6 : vector<8x16xf32>
    %c0_6 = arith.constant 0 : index
    %c0_7 = arith.constant 0 : index
    %8 = vector.load %arg7[%c0_6, %c0_7] : memref<8x16xf32, #tpu.memory_space<vmem>>, vector<8x16xf32>
    tpu.vector_store %arg7[%c0_6, %c0_7], %7 {strides = array<i32>} : memref<8x16xf32, #tpu.memory_space<vmem>>, vector<8x16xf32>,
    %c0_i32_8 = arith.constant 0 : i32
    %9 = arith.cmpi eq, %arg1, %c0_i32_8 : i32
    %10 = arith.extui %9 : i1 to i32
    %c0_i32_9 = arith.constant 0 : i32
    %11 = arith.cmpi ne, %10, %c0_i32_9 : i32
    scf.if %11 {
      %c0_10 = arith.constant 0 : index
      %c0_11 = arith.constant 0 : index
      %12 = vector.load %arg7[%c0_10, %c0_11] : memref<8x16xf32, #tpu.memory_space<vmem>>, vector<8x16xf32>
      %13 = arith.truncf %12 : vector<8x16xf32> to vector<8x16xbf16>
      %c0_12 = arith.constant 0 : index
      %c0_13 = arith.constant 0 : index
      %14 = vector.load %arg4[%c0_12, %c0_13] : memref<16x32xbf16, #tpu.memory_space<vmem>>, vector<16x32xbf16>
      %cst_14 = arith.constant dense<0.000000e+00> : vector<8x32xf32>
      %15 = tpu.matmul %13, %14, %cst_14 {dimension_numbers = #tpu.dot_dimension_numbers<[1], [0], [0], [1], [0, 0, 1, 1], [], []>} : vector<8x16xbf16>, vector<16x32xbf16>, vector<8x32xf32> -> vector<8x32xf32>
      %cst_15 = arith.constant 0.000000e+00 : f32
      %16 = vector.broadcast %cst_15 : f32 to vector<8x32xf32>
      %17 = arith.maximumf %15, %16 : vector<8x32xf32>
      %c0_16 = arith.constant 0 : index
      %c0_17 = arith.constant 0 : index
      %18 = vector.load %arg5[%c0_16, %c0_17] : memref<8x32xf32, #tpu.memory_space<vmem>>, vector<8x32xf32>
      %19 = arith.mulf %17, %18 : vector<8x32xf32>
      %20 = arith.truncf %19 : vector<8x32xf32> to vector<8x32xbf16>
      %c0_18 = arith.constant 0 : index
      %c0_19 = arith.constant 0 : index
      %21 = vector.load %arg6[%c0_18, %c0_19] : memref<8x32xbf16, #tpu.memory_space<vmem>>, vector<8x32xbf16>
      tpu.vector_store %arg6[%c0_18, %c0_19], %20 {strides = array<i32>} : memref<8x32xbf16, #tpu.memory_space<vmem>>, vector<8x32xbf16>,
    } else {
    }
    return
  }
  func.func @transform_0(%arg0: i32, %arg1: i32) -> (i32, i32) {
    %c0_i32 = arith.constant 0 : i32
    return %arg0, %arg1 : i32, i32
  }
  func.func @transform_1(%arg0: i32, %arg1: i32) -> (i32, i32) {
    %c0_i32 = arith.constant 0 : i32
    %c0_i32_0 = arith.constant 0 : i32
    return %arg1, %c0_i32 : i32, i32
  }
  func.func @transform_2(%arg0: i32, %arg1: i32) -> (i32, i32) {
    %c0_i32 = arith.constant 0 : i32
    %c0_i32_0 = arith.constant 0 : i32
    %c0_i32_1 = arith.constant 0 : i32
    return %c0_i32, %c0_i32_0 : i32, i32
  }
  func.func @transform_3(%arg0: i32, %arg1: i32) -> (i32, i32) {
    %c0_i32 = arith.constant 0 : i32
    %c0_i32_0 = arith.constant 0 : i32
    return %arg0, %c0_i32 : i32, i32
  }
  func.func @transform_4(%arg0: i32, %arg1: i32) -> (i32, i32) {
    %c0_i32 = arith.constant 0 : i32
    %c0_i32_0 = arith.constant 0 : i32
    return %arg0, %c0_i32 : i32, i32
  }
}

</mosaic_0001>

<bundles_post_ra>
// kernel: tpu_custom_call.1
= control target key start
LH: loop header
LB: loop body
LE: loop exit
PB: predicated region body
PF: predicated region fallthrough
CT: control target
= control target key end

     0   :  { %9 = vsyncpa [#allocation4], 0  ;;  %s403_s0 = inlined_call_operand.hbm [shape: bf16[8,8], index: 0, kind: input, shape index: {}]   ;;  %s404_s1 = inlined_call_operand.hbm [shape: bf16[8,16], index: 1, kind: input, shape index: {}]   ;;  %s405_s2 = inlined_call_operand.hbm [shape: bf16[16,32], index: 2, kind: input, shape index: {}]   ;;  %s406_s3 = inlined_call_operand.vmem [shape: f32[8,32], index: 3, kind: input, shape index: {}]   ;;  %s407_s4 = inlined_call_operand.hbm [shape: bf16[8,32], index: 4, kind: output, shape index: {}]  }
   0x1   :  { %10 = vsyncpa [#allocation7], 0 }
   0x2   :  { %11 = vsyncpa [#allocation5], 0  ;;  %s316_s15 = smov [#allocation6]   ;;  %s317_s17 = smov [#allocation3]  }
   0x3   :  { %s28_s16 = sshll.u32 %s316_s15, 4  ;;  %s18_s18 = sshll.u32 %s317_s17, 4  ;;  %s29_s16 = int_to_ptr.vmem [resolvable:$true] %s28_s16  ;;  %s19_s18 = int_to_ptr.vmem [resolvable:$true] %s18_s18 }
   0x4   :  { %s222_s21 = scalar_lea.hbm %s404_s1, 64 }
   0x5   :  { %p223_p0 = scmp.ne.s32.totalorder %s404_s1, %s222_s21  ;;  %p226_p1 = scmp.lt.u32.totalorder %s222_s21, %s404_s1 }
   0x7   :  { %p228_p2 = pnand %p226_p1, %p223_p0 }
   0x9   :  { %231 = shalt.err (!%p228_p2)
}
   0xa   :  { %s232_s26 = scalar_lea.vmem %s29_s16, 64  ;;  %p237_p4 = scmp.lt.s32.totalorder %s29_s16, %s29_s16 }
   0xb   :  { %p233_p3 = scmp.ne.s32.totalorder %s29_s16, %s232_s26  ;;  %p238_p5 = scmp.lt.s32.totalorder %s232_s26, %s232_s26 }
   0xd   :  { %p239_p6 = por %p238_p5, %p237_p4 }
   0xf   :  { %p240_p7 = pnand %p239_p6, %p233_p3 }
  0x11   :  { %243 = shalt.err (!%p240_p7)
}
  0x12   :  { %31 = dma.hbm_to_vmem [thread:$0]  %s404_s1, 64, %s29_s16, [#allocation7]  }
  0x13   :  { %s244_s5 = scalar_lea.hbm %s403_s0, 64 }
  0x14   :  { %p245_p8 = scmp.ne.s32.totalorder %s403_s0, %s244_s5  ;;  %p248_p9 = scmp.lt.u32.totalorder %s244_s5, %s403_s0 }
  0x16   :  { %p250_p10 = pnand %p248_p9, %p245_p8 }
  0x18   :  { %253 = shalt.err (!%p250_p10)
}
  0x19   :  { %s254_s10 = scalar_lea.vmem %s19_s18, 64  ;;  %p259_p12 = scmp.lt.s32.totalorder %s19_s18, %s19_s18 }
  0x1a   :  { %p255_p11 = scmp.ne.s32.totalorder %s19_s18, %s254_s10  ;;  %p260_p13 = scmp.lt.s32.totalorder %s254_s10, %s254_s10 }
  0x1c   :  { %p261_p0 = por %p260_p13, %p259_p12 }
  0x1e   :  { %p262_p1 = pnand %p261_p0, %p255_p11 }
  0x20   :  { %265 = shalt.err (!%p262_p1)
}
  0x21   :  { %21 = dma.hbm_to_vmem [thread:$0]  %s403_s0, 64, %s19_s18, [#allocation4]  }
  0x22   :  { %s318_s12 = smov [#allocation8]   ;;  %s266_s16 = scalar_lea.hbm %s405_s2, 128 }
  0x23   :  { %s37_s13 = sshll.u32 %s318_s12, 4  ;;  %p267_p2 = scmp.ne.s32.totalorder %s405_s2, %s266_s16  ;;  %s38_s13 = int_to_ptr.vmem [resolvable:$true] %s37_s13 }
  0x24   :  { %p270_p3 = scmp.lt.u32.totalorder %s266_s16, %s405_s2 }
  0x26   :  { %p272_p4 = pnand %p270_p3, %p267_p2 }
  0x28   :  { %275 = shalt.err (!%p272_p4)
}
  0x29   :  { %s276_s22 = scalar_lea.vmem %s38_s13, 128  ;;  %p281_p6 = scmp.lt.s32.totalorder %s38_s13, %s38_s13 }
  0x2a   :  { %p277_p5 = scmp.ne.s32.totalorder %s38_s13, %s276_s22  ;;  %p282_p7 = scmp.lt.s32.totalorder %s276_s22, %s276_s22 }
  0x2c   :  { %p283_p8 = por %p282_p7, %p281_p6 }
  0x2e   :  { %p284_p9 = pnand %p283_p8, %p277_p5 }
  0x30   :  { %287 = shalt.err (!%p284_p9)
}
  0x31   :  { %s319_s0 = smov 64   ;;  %s320_s18 = smov 4  }
  0x32   :  { %43 = dma.hbm_to_vmem [thread:$0]  %s405_s2, 128, %s38_s13, [#allocation7], %s319_s0, %s319_s0, %s320_s18  }
  0x33   :  { %310 = dma.done.wait [#allocation4], 64  }
  0x34   :  { %311 = vsyncadd [#allocation4], 4294967232 }
  0x35   :  { %312 = dma.done.wait [#allocation7], 192  }
  0x36   :  { %313 = vsyncadd [#allocation7], 4294967104  ;;  %v321_v0 = vmov 0.0   ;;  %vm322_vm0 = vmmov 0   ;;  %vm60_vm1 = vcmask 130048   ;;  %vm69_vm2 = vcmask 1043456  }
  0x37   :  { %201 = vmatprep.subr.bf16.mxu0 %v321_v0  ;;  %203 = vmatprep.mubr.msk.bf16.mxu0 %vm322_vm0, %v321_v0  ;;  %61 = vst.msk [vmem:[#allocation2] sm:$0xff] %vm60_vm1, %v321_v0  ;;  %v64_v1 = vld [vmem:[#allocation6] sm:$0xf]  ;;  %v63_v3 = vld [vmem:[#allocation3] sm:$0xf]  ;;  %vm65_vm3 = vcmask 64512  }
  0x38   :  { %207 = vmatprep.subr.bf16.mxu1 %v321_v0  ;;  %209 = vmatprep.mubr.msk.bf16.mxu1 %vm322_vm0, %v321_v0  ;;  %v71_v2 = vsel %vm69_vm2, %v64_v1, 0  ;;  %v221_v4 = vld [vmem:[#allocation8] sm:$0xff]   ;;  %v173_v14 = vld [vmem:[%s406_s3] sm:$0xff]  ;;  %s323_s26 = smov [#allocation9]   ;;  %vm176_vm4 = vcmask 257024  }
  0x39   :  { %202 = vmatpush3.bf16.msra.mxu0 %v71_v2  ;;  %208 = vmatpush3.bf16.msra.mxu1 %v221_v4  ;;  %s184_s27 = sshll.u32 %s323_s26, 4  ;;  %s185_s27 = int_to_ptr.vmem [resolvable:$true] %s184_s27 }
  0x3a   :  { %s288_s28 = scalar_lea.vmem %s185_s27, 64  ;;  %p293_p11 = scmp.lt.s32.totalorder %s185_s27, %s185_s27 }
  0x3b   :  { %p289_p10 = scmp.ne.s32.totalorder %s185_s27, %s288_s28  ;;  %p294_p12 = scmp.lt.s32.totalorder %s288_s28, %s288_s28 }
  0x3c   :  { %204 = vmatmul.mubr.msk.bf16.vlgmr.msra.gmra.mrb[0].mxu0 %vm65_vm3, %v63_v3 }
  0x3d   :  { %p295_p13 = por %p294_p12, %p293_p11 }
  0x3e   :  { %v62_v5 = vld [vmem:[#allocation2] sm:$0xff] }
  0x3f   :  { %p296_p0 = pnand %p295_p13, %p289_p10 }
 0x10f   :  { %v107_v6 = vpop.f32.mrb[0].mxu0 }
 0x110   :  { %v113_v7 = vadd.f32 %v107_v6, %v62_v5  ;;  %v205_v8 = vpop.f32.mrb[1].mxu0 }
 0x111   :  { %v110_v9 = vpop.f32.mrb[2].mxu0 }
 0x112   :  { %115 = vst.msk [vmem:[#allocation2] sm:$0xff] %vm60_vm1, %v113_v7  ;;  %v206_v10 = vpop.f32.mrb[3].mxu0 }
 0x119   :  { %v119_v11 = vld [vmem:[#allocation2] sm:$0xff] }
 0x11a   :  { %v120_v12 = vpack.c.bf16 %v119_v11, %v119_v11 }
 0x11c   :  { %210 = vmatmul.mubr.msk.bf16.vlgmr.msra.gmra.mrb[0].mxu1 %vm60_vm1, %v120_v12 }
 0x1ef   :  { %v166_v13 = vpop.f32.mrb[0].mxu1 }
 0x1f0   :  { %v172_v15 = vmax.f32 %v166_v13, 0.0  ;;  %v211_v16 = vpop.f32.mrb[1].mxu1 }
 0x1f1   :  { %v169_v17 = vpop.f32.mrb[2].mxu1 }
 0x1f2   :  { %v174_v18 = vmul.f32 %v173_v14, %v172_v15  ;;  %v212_v19 = vpop.f32.mrb[3].mxu1 }
 0x1f4   :  { %v175_v20 = vpack.c.bf16 %v174_v18, %v174_v18 }
 0x1f6   :  { %177 = vst.msk [vmem:[#allocation9] sm:$0xf] %vm176_vm4, %v175_v20 }
 0x1f7   :  { %299 = shalt.err (!%p296_p0)
}
 0x1f8   :  { %s300_s30 = scalar_lea.hbm %s407_s4, 64 }
 0x1f9   :  { %p301_p1 = scmp.ne.s32.totalorder %s407_s4, %s300_s30  ;;  %p304_p2 = scmp.lt.u32.totalorder %s300_s30, %s407_s4 }
 0x1fb   :  { %p306_p3 = pnand %p304_p2, %p301_p1 }
 0x1fd   :  { %309 = shalt.err (!%p306_p3)
}
 0x1fe   :  { %187 = dma.vmem_to_hbm [thread:$0]  %s185_s27, 64, %s407_s4, [#allocation5]  }
 0x1ff   :  { %314 = dma.done.wait [#allocation5], 64  }
 0x200   :  { %315 = vsyncadd [#allocation5], 4294967232 }
 0x201   :  { %191 = vsyncpa [#allocation4], 1 }
 0x202   :  { %192 = vsyncpa [#allocation7], 1 }
 0x203   :  { %193 = vsyncpa [#allocation5], 1 }

</bundles_post_ra>
